<compile_context>
chip_gen: v7x
topology: tpu7x:2x2x1
jax: 0.10.0
libtpu: 0.0.40
codegen_flags: <defaults>
</compile_context>

<pallas_src>
import jax
import jax.numpy as jnp
import numpy as np
from jax.experimental import pallas as pl
from jax.experimental.pallas import tpu as pltpu


# ----------------------------------------------------------------------------
# Row-tiled Pallas linear kernel:  out = x @ w_t + b   (pctx and x-projection)
# ----------------------------------------------------------------------------
def _linear_kernel(x_ref, w_ref, b_ref, o_ref):
    o_ref[...] = (
        jnp.dot(x_ref[...], w_ref[...], preferred_element_type=jnp.float32)
        + b_ref[...]
    )


def pallas_linear(x2d, w_t, b_row, block_rows=512):
    n, k = x2d.shape
    out = w_t.shape[1]
    if n <= block_rows:
        bm, n_p, x_p = n, n, x2d
    else:
        n_p = ((n + block_rows - 1) // block_rows) * block_rows
        bm = block_rows
        x_p = jnp.pad(x2d, ((0, n_p - n), (0, 0)))
    y = pl.pallas_call(
        _linear_kernel,
        out_shape=jax.ShapeDtypeStruct((n_p, out), jnp.float32),
        grid_spec=pltpu.PrefetchScalarGridSpec(
            num_scalar_prefetch=0,
            grid=(n_p // bm,),
            in_specs=[
                pl.BlockSpec((bm, k), lambda i: (i, 0)),
                pl.BlockSpec((k, out), lambda i: (0, 0)),
                pl.BlockSpec((1, out), lambda i: (0, 0)),
            ],
            out_specs=pl.BlockSpec((bm, out), lambda i: (i, 0)),
        ),
        compiler_params=pltpu.CompilerParams(
            dimension_semantics=("parallel",)),
    )(x_p, w_t, b_row)
    return y[:n] if n_p != n else y


# ----------------------------------------------------------------------------
# Per-step decoder kernel: grid=(Ty,), h/c carried in VMEM scratch.
# ----------------------------------------------------------------------------
def _decoder_step_kernel(xproj_ref, ymask_ref, pctx_ref, ctx_ref, xm2_ref,
                         h0_ref, c0_ref, Ut_ref, Wfused_ref, Wxt_ref,
                         bx_ref, Uatt_ref, out_ref, h_sc, c_sc):
    B, Tx, C = ctx_ref.shape
    H = h0_ref.shape[-1]
    pad = out_ref.shape[-1] - (2 * H + C)

    @pl.when(pl.program_id(0) == 0)
    def _():
        h_sc[...] = h0_ref[...]
        c_sc[...] = c0_ref[...]

    pre_h = h_sc[...]                         # (B, H)
    pre_c = c_sc[...]                         # (B, H)
    ym = ymask_ref[0]                         # (B, 1)
    xproj = xproj_ref[0]                      # (B, 4H), x-proj hoisted out

    # --- gate block 1: only the recurrent matmul stays in the loop
    preact1 = xproj + jnp.dot(pre_h, Ut_ref[...],
                              preferred_element_type=jnp.float32)
    sg1 = jax.nn.sigmoid(preact1[:, :3 * H])  # sigmoid only on i|f|o columns
    g1 = jnp.tanh(preact1[:, 3 * H:])         # tanh only on trailing gate
    i1 = sg1[:, 0:H]
    f1 = sg1[:, H:2 * H]
    o1 = sg1[:, 2 * H:3 * H]
    c1 = f1 * pre_c + i1 * g1
    h1 = o1 * jnp.tanh(c1)
    h1 = ym * h1 + (1.0 - ym) * pre_h

    # --- fused h1 projection (one MXU push): h1 @ [Ux^T | W_comb_att^T]
    fused = jnp.dot(h1, Wfused_ref[...], preferred_element_type=jnp.float32)
    ux_part = fused[:, 0:4 * H]               # (B, 4H)
    h_att = fused[:, 4 * H:]                  # (B, C)

    # --- attention, lane-dense over Tx; operands read from Refs each step
    xm2 = xm2_ref[...]                                             # (B, Tx)
    unreg = jnp.tanh(pctx_ref[...] + h_att[:, None, :]) * xm2[:, :, None]
    scores = jnp.sum(unreg * Uatt_ref[...][None, :, :], axis=-1)   # (B, Tx)
    smax = jnp.max(scores, axis=-1, keepdims=True)
    ew = jnp.exp(scores - smax) * xm2
    # Matches reference: raw-sum divide (NaN on a fully-masked row, as PyTorch).
    denom = jnp.sum(ew, axis=-1, keepdims=True)
    watt = ew * pl.reciprocal(denom, approx=False)                 # (B, Tx)
    # VPU multiply + XLU reduce instead of an M=1 MXU push
    atted = jnp.sum(watt[:, :, None] * ctx_ref[...], axis=1)       # (B, C)

    # --- gate block 2 (context-conditioned)
    preact2 = ux_part + bx_ref[...] + jnp.dot(
        atted, Wxt_ref[...], preferred_element_type=jnp.float32)
    sg2 = jax.nn.sigmoid(preact2[:, :3 * H])
    g2 = jnp.tanh(preact2[:, 3 * H:])
    i2 = sg2[:, 0:H]
    f2 = sg2[:, H:2 * H]
    o2 = sg2[:, 2 * H:3 * H]
    c2 = f2 * c1 + i2 * g2
    h2 = o2 * jnp.tanh(c2)
    h2 = ym * h2 + (1.0 - ym) * h1

    # carry for next grid step
    h_sc[...] = h2
    c_sc[...] = c2

    # one consolidated, lane-dense write per step: [h2 | c2 | atted | 0-pad]
    parts = [h2, c2, atted]
    if pad > 0:
        parts.append(jnp.zeros((B, pad), jnp.float32))
    out_ref[0] = jnp.concatenate(parts, axis=-1)


def lstm_attention_decoder(y_emb, context, init_state, x_mask, y_mask, params):
    Ty, B, In = y_emb.shape
    Tx, _, C = context.shape
    H = params["U"].shape[1]
    h0, c0 = init_state

    # Layout plumbing (one-time, XLA): batch-major context / mask.
    ctx_b = jnp.transpose(context, (1, 0, 2))             # (B, Tx, C)
    xm2 = jnp.transpose(x_mask[:, :, 0], (1, 0))          # (B, Tx)

    # Loop-invariant projections (row-tiled Pallas linears, M = B*Tx / Ty*B).
    pctx = pallas_linear(ctx_b.reshape(B * Tx, C), params["Wc_att"].T,
                         params["b_att"][None, :]).reshape(B, Tx, C)
    x_proj = pallas_linear(y_emb.reshape(Ty * B, In), params["W"].T,
                           params["b"][None, :]).reshape(Ty, B, 4 * H)

    Ut = params["U"].T                                                  # (H, 4H)
    W_fused = jnp.concatenate([params["Ux"].T, params["W_comb_att"].T],
                              axis=1)                                   # (H, 4H+C)
    Wxt = params["Wx"].T                                                # (C, 4H)
    bx_row = params["bx"][None, :]                                      # (1, 4H)
    Uatt = params["U_att"]                                              # (1, C)

    w_out = 2 * H + C
    w_pad = ((w_out + 127) // 128) * 128      # lane-dense output slab width

    out = pl.pallas_call(
        _decoder_step_kernel,
        out_shape=jax.ShapeDtypeStruct((Ty, B, w_pad), jnp.float32),
        grid_spec=pltpu.PrefetchScalarGridSpec(
            num_scalar_prefetch=0,
            grid=(Ty,),
            in_specs=[
                pl.BlockSpec((1, B, 4 * H), lambda t: (t, 0, 0)),   # x_proj (streamed)
                pl.BlockSpec((1, B, 1), lambda t: (t, 0, 0)),       # y_mask (streamed)
                pl.BlockSpec((B, Tx, C), lambda t: (0, 0, 0)),      # pctx (resident)
                pl.BlockSpec((B, Tx, C), lambda t: (0, 0, 0)),      # context (resident)
                pl.BlockSpec((B, Tx), lambda t: (0, 0)),            # x_mask (resident)
                pl.BlockSpec((B, H), lambda t: (0, 0)),             # h0
                pl.BlockSpec((B, H), lambda t: (0, 0)),             # c0
                pl.BlockSpec((H, 4 * H), lambda t: (0, 0)),         # U^T
                pl.BlockSpec((H, 4 * H + C), lambda t: (0, 0)),     # [Ux^T|W_comb_att^T]
                pl.BlockSpec((C, 4 * H), lambda t: (0, 0)),         # Wx^T
                pl.BlockSpec((1, 4 * H), lambda t: (0, 0)),         # bx
                pl.BlockSpec((1, C), lambda t: (0, 0)),             # U_att
            ],
            out_specs=pl.BlockSpec((1, B, w_pad), lambda t: (t, 0, 0)),
            scratch_shapes=[pltpu.VMEM((B, H), jnp.float32),        # h carry
                            pltpu.VMEM((B, H), jnp.float32)],       # c carry
        ),
        compiler_params=pltpu.CompilerParams(
            dimension_semantics=("arbitrary",)),
    )(x_proj, y_mask, pctx, ctx_b, xm2, h0, c0,
      Ut, W_fused, Wxt, bx_row, Uatt)

    hs = out[:, :, 0:H]
    cs = out[:, :, H:2 * H]
    atts = out[:, :, 2 * H:w_out]
    return (hs, cs), atts


# ----------------------------------------------------------------------------
# Pure-JAX reference (mirrors the PyTorch forward) for verification
# ----------------------------------------------------------------------------
def reference_decoder(y_emb, context, init_state, x_mask, y_mask, p):
    pctx = jnp.einsum("tbc,dc->tbd", context, p["Wc_att"]) + p["b_att"]
    x = jnp.einsum("tbi,hi->tbh", y_emb, p["W"]) + p["b"]

    def step(carry, inp):
        pre_h, pre_c = carry
        x_t, ym = inp
        preact1 = x_t + pre_h @ p["U"].T
        i1, f1, o1, g1 = jnp.split(preact1, 4, axis=1)
        i1, f1, o1 = jax.nn.sigmoid(i1), jax.nn.sigmoid(f1), jax.nn.sigmoid(o1)
        c1 = f1 * pre_c + i1 * jnp.tanh(g1)
        h1 = o1 * jnp.tanh(c1)
        h1 = ym * h1 + (1.0 - ym) * pre_h

        h_att = h1 @ p["W_comb_att"].T
        unreg = jnp.tanh(pctx + h_att[None]) * x_mask
        unreg_att = unreg @ p["U_att"].T
        wa = jnp.exp(unreg_att - jnp.max(unreg_att, axis=0, keepdims=True)) * x_mask
        wa = wa / jnp.sum(wa, axis=0, keepdims=True)
        atted = jnp.sum(wa * context, axis=0)

        preact2 = h1 @ p["Ux"].T + atted @ p["Wx"].T + p["bx"]
        i2, f2, o2, g2 = jnp.split(preact2, 4, axis=1)
        i2, f2, o2 = jax.nn.sigmoid(i2), jax.nn.sigmoid(f2), jax.nn.sigmoid(o2)
        c2 = f2 * c1 + i2 * jnp.tanh(g2)
        h2 = o2 * jnp.tanh(c2)
        h2 = ym * h2 + (1.0 - ym) * h1
        return (h2, c2), (h2, c2, atted)

    _, (hs, cs, atts) = jax.lax.scan(step, init_state, (x, y_mask))
    return (hs, cs), atts


if __name__ == "__main__":
    key = jax.random.PRNGKey(0)
    input_size, hidden_size, ctx_size = 16, 32, 32
    Ty, Tx, B = 8, 16, 2

    keys = jax.random.split(key, 16)

    def rnd(k, shape, scale=0.1):
        return (scale * jax.random.normal(k, shape)).astype(jnp.float32)

    # Deterministic synthetic parameters (orthogonal init approximated by
    # scaled normal; biases zero, matching init_bias conventions).
    params = {
        "W": rnd(keys[0], (4 * hidden_size, input_size)),
        "U": rnd(keys[1], (4 * hidden_size, hidden_size)),
        "b": jnp.zeros((4 * hidden_size,), jnp.float32),
        "Wx": rnd(keys[2], (4 * hidden_size, ctx_size)),
        "Ux": rnd(keys[3], (4 * hidden_size, hidden_size)),
        "bx": jnp.zeros((4 * hidden_size,), jnp.float32),
        "Wc_att": rnd(keys[4], (ctx_size, ctx_size)),
        "b_att": jnp.zeros((ctx_size,), jnp.float32),
        "W_comb_att": rnd(keys[5], (ctx_size, hidden_size)),
        "U_att": rnd(keys[6], (1, ctx_size)),
    }

    y_emb = rnd(keys[7], (Ty, B, input_size), 1.0)
    context = rnd(keys[8], (Tx, B, ctx_size), 1.0)
    h0 = rnd(keys[9], (B, hidden_size), 1.0)
    c0 = rnd(keys[10], (B, hidden_size), 1.0)
    # padding-style masks: batch element 1 has trailing padded positions
    x_mask = jnp.ones((Tx, B, 1), jnp.float32).at[Tx - 3:, 1, :].set(0.0)
    y_mask = jnp.ones((Ty, B, 1), jnp.float32).at[Ty - 2:, 1, :].set(0.0)

    (hs, cs), atts = lstm_attention_decoder(
        y_emb, context, (h0, c0), x_mask, y_mask, params)
    jax.block_until_ready((hs, cs, atts))

    (hs_r, cs_r), atts_r = reference_decoder(
        y_emb, context, (h0, c0), x_mask, y_mask, params)

    assert np.allclose(np.asarray(hs), np.asarray(hs_r), atol=1e-5, rtol=1e-5)
    assert np.allclose(np.asarray(cs), np.asarray(cs_r), atol=1e-5, rtol=1e-5)
    assert np.allclose(np.asarray(atts), np.asarray(atts_r), atol=2e-5, rtol=1e-5)

    print("KERNEL_OK")
</pallas_src>

<mosaic_0001>
module attributes {stable_mosaic.version = 11 : i64} {
  func.func @_linear_kernel(%arg0: i32, %arg1: memref<32x32xf32, #tpu.memory_space<vmem>>, %arg2: memref<32x32xf32, #tpu.memory_space<vmem>>, %arg3: memref<1x32xf32, #tpu.memory_space<vmem>>, %arg4: memref<32x32xf32, #tpu.memory_space<vmem>>) attributes {dimension_semantics = [#tpu.dimension_semantics<parallel>], iteration_bounds = array<i64: 1>, scalar_prefetch = 0 : i64, scratch_operands = 0 : i64, tpu.core_type = #tpu.core_type<tc>, window_params = [{transform_indices = @transform_0, window_bounds = array<i64: 32, 32>}, {pipeline_mode = #tpu.pipeline_mode<synchronous>, transform_indices = @transform_1, window_bounds = array<i64: 32, 32>}, {pipeline_mode = #tpu.pipeline_mode<synchronous>, transform_indices = @transform_2, window_bounds = array<i64: 1, 32>}, {transform_indices = @transform_3, window_bounds = array<i64: 32, 32>}]} {
    %c0 = arith.constant 0 : index
    %c0_0 = arith.constant 0 : index
    %0 = vector.load %arg1[%c0, %c0_0] : memref<32x32xf32, #tpu.memory_space<vmem>>, vector<32x32xf32>
    %c0_1 = arith.constant 0 : index
    %c0_2 = arith.constant 0 : index
    %1 = vector.load %arg2[%c0_1, %c0_2] : memref<32x32xf32, #tpu.memory_space<vmem>>, vector<32x32xf32>
    %cst = arith.constant dense<0.000000e+00> : vector<32x32xf32>
    %2 = tpu.matmul %0, %1, %cst {dimension_numbers = #tpu.dot_dimension_numbers<[1], [0], [0], [1], [0, 0, 1, 1], [], []>} : vector<32x32xf32>, vector<32x32xf32>, vector<32x32xf32> -> vector<32x32xf32>
    %c0_3 = arith.constant 0 : index
    %c0_4 = arith.constant 0 : index
    %3 = vector.load %arg3[%c0_3, %c0_4] : memref<1x32xf32, #tpu.memory_space<vmem>>, vector<1x32xf32>
    %4 = vector.broadcast %3 : vector<1x32xf32> to vector<32x32xf32>
    %5 = arith.addf %2, %4 : vector<32x32xf32>
    %c0_5 = arith.constant 0 : index
    %c0_6 = arith.constant 0 : index
    %6 = vector.load %arg4[%c0_5, %c0_6] : memref<32x32xf32, #tpu.memory_space<vmem>>, vector<32x32xf32>
    tpu.vector_store %arg4[%c0_5, %c0_6], %5 {strides = array<i32>} : memref<32x32xf32, #tpu.memory_space<vmem>>, vector<32x32xf32>,
    return
  }
  func.func @transform_0(%arg0: i32) -> (i32, i32) {
    %c0_i32 = arith.constant 0 : i32
    %c0_i32_0 = arith.constant 0 : i32
    return %arg0, %c0_i32 : i32, i32
  }
  func.func @transform_1(%arg0: i32) -> (i32, i32) {
    %c0_i32 = arith.constant 0 : i32
    %c0_i32_0 = arith.constant 0 : i32
    %c0_i32_1 = arith.constant 0 : i32
    return %c0_i32, %c0_i32_0 : i32, i32
  }
  func.func @transform_2(%arg0: i32) -> (i32, i32) {
    %c0_i32 = arith.constant 0 : i32
    %c0_i32_0 = arith.constant 0 : i32
    %c0_i32_1 = arith.constant 0 : i32
    return %c0_i32, %c0_i32_0 : i32, i32
  }
  func.func @transform_3(%arg0: i32) -> (i32, i32) {
    %c0_i32 = arith.constant 0 : i32
    %c0_i32_0 = arith.constant 0 : i32
    return %arg0, %c0_i32 : i32, i32
  }
}

</mosaic_0001>

<bundles_post_ra>
// kernel: tpu_custom_call.1
= control target key start
LH: loop header
LB: loop body
LE: loop exit
PB: predicated region body
PF: predicated region fallthrough
CT: control target
= control target key end

     0   :  { %8 = vsyncpa [#allocation3], 0  ;;  %s375_s0 = inlined_call_operand.hbm [shape: f32[32,32], index: 0, kind: input, shape index: {}]   ;;  %s376_s1 = inlined_call_operand.hbm [shape: f32[32,32], index: 1, kind: input, shape index: {}]   ;;  %s377_s2 = inlined_call_operand.vmem [shape: f32[1,32], index: 2, kind: input, shape index: {}]   ;;  %s378_s3 = inlined_call_operand.hbm [shape: f32[32,32], index: 3, kind: output, shape index: {}]  }
   0x1   :  { %9 = vsyncpa [#allocation6], 0 }
   0x2   :  { %10 = vsyncpa [#allocation4], 0  ;;  %s294_s12 = smov [#allocation2]   ;;  %s222_s16 = scalar_lea.hbm %s375_s0, 512 }
   0x3   :  { %s16_s13 = sshll.u32 %s294_s12, 4  ;;  %p223_p0 = scmp.ne.s32.totalorder %s375_s0, %s222_s16  ;;  %s17_s13 = int_to_ptr.vmem [resolvable:$true] %s16_s13 }
   0x4   :  { %p226_p1 = scmp.lt.u32.totalorder %s222_s16, %s375_s0 }
   0x6   :  { %p228_p2 = pnand %p226_p1, %p223_p0 }
   0x8   :  { %231 = shalt.err (!%p228_p2)
}
   0x9   :  { %s232_s21 = scalar_lea.vmem %s17_s13, 512  ;;  %p237_p4 = scmp.lt.s32.totalorder %s17_s13, %s17_s13 }
   0xa   :  { %p233_p3 = scmp.ne.s32.totalorder %s17_s13, %s232_s21  ;;  %p238_p5 = scmp.lt.s32.totalorder %s232_s21, %s232_s21 }
   0xc   :  { %p239_p6 = por %p238_p5, %p237_p4 }
   0xe   :  { %p240_p7 = pnand %p239_p6, %p233_p3 }
  0x10   :  { %243 = shalt.err (!%p240_p7)
}
  0x11   :  { %s295_s22 = smov 128   ;;  %s296_s23 = smov 8  }
  0x12   :  { %22 = dma.hbm_to_vmem [thread:$0]  %s375_s0, 512, %s17_s13, [#allocation3], %s295_s22, %s295_s22, %s296_s23  }
  0x13   :  { %s297_s26 = smov [#allocation5]   ;;  %s244_s30 = scalar_lea.hbm %s376_s1, 512 }
  0x14   :  { %s28_s27 = sshll.u32 %s297_s26, 4  ;;  %p245_p8 = scmp.ne.s32.totalorder %s376_s1, %s244_s30  ;;  %s29_s27 = int_to_ptr.vmem [resolvable:$true] %s28_s27 }
  0x15   :  { %p248_p9 = scmp.lt.u32.totalorder %s244_s30, %s376_s1 }
  0x17   :  { %p250_p10 = pnand %p248_p9, %p245_p8 }
  0x19   :  { %253 = shalt.err (!%p250_p10)
}
  0x1a   :  { %s254_s8 = scalar_lea.vmem %s29_s27, 512  ;;  %p259_p12 = scmp.lt.s32.totalorder %s29_s27, %s29_s27 }
  0x1b   :  { %p255_p11 = scmp.ne.s32.totalorder %s29_s27, %s254_s8  ;;  %p260_p13 = scmp.lt.s32.totalorder %s254_s8, %s254_s8 }
  0x1d   :  { %p261_p0 = por %p260_p13, %p259_p12 }
  0x1f   :  { %p262_p1 = pnand %p261_p0, %p255_p11 }
  0x21   :  { %265 = shalt.err (!%p262_p1)
}
  0x22   :  { %34 = dma.hbm_to_vmem [thread:$0]  %s376_s1, 512, %s29_s27, [#allocation6], %s295_s22, %s295_s22, %s296_s23  }
  0x23   :  { %288 = dma.done.wait [#allocation3], 512  }
  0x24   :  { %289 = vsyncadd [#allocation3], 4294966784 }
  0x25   :  { %290 = dma.done.wait [#allocation6], 512  }
  0x26   :  { %291 = vsyncadd [#allocation6], 4294966784  ;;  %vm58_vm0 = vcmask 261120   ;;  %v47_v0 = vld [vmem:[#allocation5] sm:$0xff]  ;;  %v48_v1 = vld [vmem:[#allocation5 + $0x8] sm:$0xff]  ;;  %s298_s11 = smov [#allocation7]  }
  0x27   :  { %v49_v2 = vld [vmem:[#allocation5 + $0x10] sm:$0xff]  ;;  %v205_v3 = vpack.c.bf16 %v48_v1, %v47_v0  ;;  %v50_v4 = vld [vmem:[#allocation5 + $0x18] sm:$0xff]  ;;  %v43_v5 = vld [vmem:[#allocation2] sm:$0xff]  ;;  %s165_s12 = sshll.u32 %s298_s11, 4  ;;  %s166_s12 = int_to_ptr.vmem [resolvable:$true] %s165_s12 }
  0x28   :  { %v45_v6 = vld [vmem:[#allocation2 + $0x10] sm:$0xff]  ;;  %v209_v7 = vpack.c.bf16 %v50_v4, %v49_v2  ;;  %199 = vmatprep.mubr.msk.f32.mxu0 %vm58_vm0, %v43_v5  ;;  %v44_v8 = vld [vmem:[#allocation2 + $0x8] sm:$0xff]  ;;  %v46_v9 = vld [vmem:[#allocation2 + $0x18] sm:$0xff]  ;;  %p271_p3 = scmp.lt.s32.totalorder %s166_s12, %s166_s12 }
  0x29   :  { %202 = vmatprep.mubr.msk.f32.mxu1 %vm58_vm0, %v45_v6  ;;  %206 = vmatprep.subr.bf16.mxu0 %v205_v3  ;;  %v178_v10 = vld [vmem:[%s377_s2] ss:$0 sm:$0xff]  ;;  %s266_s2 = scalar_lea.vmem %s166_s12, 512 }
  0x2a   :  { %213 = vmatprep.subr.bf16.mxu1 %v205_v3  ;;  %208 = vmatpush3.bf16.msra.mxu0 %v205_v3  ;;  %p267_p2 = scmp.ne.s32.totalorder %s166_s12, %s266_s2  ;;  %p272_p4 = scmp.lt.s32.totalorder %s266_s2, %s266_s2 }
  0x2b   :  { %215 = vmatpush3.bf16.msra.mxu1 %v205_v3  ;;  %210 = vmatprep.subr.bf16.mxu0 %v209_v7 }
  0x2c   :  { %214 = vmatprep.subr.bf16.mxu1 %v209_v7  ;;  %p273_p5 = por %p272_p4, %p271_p3 }
  0x2e   :  { %212 = vmatpush3.bf16.msra.mxu0 %v209_v7  ;;  %p274_p6 = pnand %p273_p5, %p267_p2 }
  0x2f   :  { %216 = vmatpush3.bf16.msra.mxu1 %v209_v7 }
  0x31   :  { %200 = vmatmul.mubr.msk.f32.vlgmr.msra.gmra.mrb[0].mxu0 %vm58_vm0, %v44_v8 }
  0x32   :  { %203 = vmatmul.mubr.msk.f32.vlgmr.msra.gmra.mrb[0].mxu1 %vm58_vm0, %v46_v9 }
 0x104   :  { %v201_v11 = vpop.f32.mrb[0].mxu0 }
 0x105   :  { %v204_v12 = vpop.f32.mrb[0].mxu1  ;;  %v143_v13 = vadd.f32 %v201_v11, %v178_v10  ;;  %v137_v15 = vpop.f32.mrb[1].mxu0 }
 0x106   :  { %v153_v14 = vadd.f32 %v204_v12, %v178_v10  ;;  %v147_v16 = vpop.f32.mrb[1].mxu1  ;;  %v138_v17 = vadd.f32 %v178_v10, %v137_v15 }
 0x107   :  { %v148_v18 = vadd.f32 %v178_v10, %v147_v16  ;;  %157 = vst.msk [vmem:[#allocation7 + $0x8] sm:$0xff] %vm58_vm0, %v143_v13 }
 0x108   :  { %159 = vst.msk [vmem:[#allocation7 + $0x18] sm:$0xff] %vm58_vm0, %v153_v14  ;;  %156 = vst.msk [vmem:[#allocation7] sm:$0xff] %vm58_vm0, %v138_v17 }
 0x109   :  { %158 = vst.msk [vmem:[#allocation7 + $0x10] sm:$0xff] %vm58_vm0, %v148_v18 }
 0x10a   :  { %277 = shalt.err (!%p274_p6)
}
 0x10b   :  { %s278_s15 = scalar_lea.hbm %s378_s3, 512 }
 0x10c   :  { %p279_p7 = scmp.ne.s32.totalorder %s378_s3, %s278_s15  ;;  %p282_p8 = scmp.lt.u32.totalorder %s278_s15, %s378_s3 }
 0x10e   :  { %p284_p9 = pnand %p282_p8, %p279_p7 }
 0x110   :  { %287 = shalt.err (!%p284_p9)
}
 0x111   :  { %171 = dma.vmem_to_hbm [thread:$0]  %s166_s12, 512, %s378_s3, [#allocation4], %s295_s22, %s295_s22, %s296_s23  }
 0x112   :  { %292 = dma.done.wait [#allocation4], 512  }
 0x113   :  { %293 = vsyncadd [#allocation4], 4294966784 }
 0x114   :  { %175 = vsyncpa [#allocation3], 1 }
 0x115   :  { %176 = vsyncpa [#allocation6], 1 }
 0x116   :  { %177 = vsyncpa [#allocation4], 1 }

</bundles_post_ra>
